<compile_context>
chip_gen: v5e
topology: v5e:2x2
jax: 0.10.0
libtpu: 0.0.40
codegen_flags: <defaults>
</compile_context>

<pallas_src>
import jax
import jax.numpy as jnp
import numpy as np
from jax import lax
from jax.experimental import pallas as pl
from jax.experimental.pallas import tpu as pltpu

C_IN = 5    # [cls, x, y, w, h]
C_PAD = 8   # channel dim padded to a full sublane group; rows 5..7 weighted 0


def _round_up(x, m):
    return ((x + m - 1) // m) * m


def _pick_tile_n(n_pad, m_pad, max_tile=2048, sel_budget_bytes=8 * 1024 * 1024):
    """Largest multiple of 128 dividing n_pad, capped by max_tile and by a
    VMEM budget for the (tile_n, m_pad) f32 selection slab (v7x-safe)."""
    budget_tile = max(128, (sel_budget_bytes // (4 * m_pad)) // 128 * 128)
    cap = min(max_tile, n_pad, budget_tile)
    t = cap
    while t >= 128:
        if n_pad % t == 0:
            return t
        t -= 128
    return 128


def _make_kernel(batch_size, n_true, n_pad, m_pad, tile_n):
    inv_cls = 1.0 / float(batch_size * n_true)        # BCE mean over B*N
    inv_box = 1.0 / float(batch_size * n_true * 4)    # SmoothL1 mean over B*N*4
    n_chunks = tile_n // 128
    mask_pad_cols = (n_true != n_pad)                 # trace-time decision

    def kernel(pred_ref, tgt_ref, out_ref):
        n_idx = pl.program_id(1)

        # Per-channel loss weights: row 0 = cls (BCE), rows 1..4 = box
        # (SmoothL1), rows 5..7 = channel padding -> weight 0.  One vreg.
        ch = lax.broadcasted_iota(jnp.int32, (C_PAD, 1), 0)
        w_cls = jnp.where(ch == 0, inv_cls, 0.0).astype(jnp.float32)
        w_box = jnp.where((ch >= 1) & (ch < C_IN), inv_box, 0.0).astype(jnp.float32)

        x = pred_ref[...]                             # (8, tile_n), channel-major

        def write_tile_loss(y):
            # Fused BCEWithLogits + SmoothL1, blended per channel by the
            # (8,1) weight vectors (no big iota/compare/select per slab).
            if y is None:                             # specialized y == 0 path
                bce = jnp.maximum(x, 0.0) + jnp.log1p(jnp.exp(-jnp.abs(x)))
                d = x
            else:
                bce = jnp.maximum(x, 0.0) - x * y + jnp.log1p(jnp.exp(-jnp.abs(x)))
                d = x - y
            ad = jnp.abs(d)
            sl1 = jnp.where(ad < 1.0, 0.5 * d * d, ad - 0.5)
            loss_e = bce * w_cls + sl1 * w_box        # (8, tile_n)

            if mask_pad_cols:                         # only emitted when N < n_pad
                col = (lax.broadcasted_iota(jnp.int32, (C_PAD, tile_n), 1)
                       + n_idx * tile_n)
                loss_e = jnp.where(col < n_true, loss_e, 0.0)

            # Lane-wise fold tile_n -> 128 on the VPU; the cross-lane/sublane
            # reduce is deferred to the wrapper.
            acc = loss_e[:, 0:128]
            for c in range(1, n_chunks):
                acc = acc + loss_e[:, c * 128:(c + 1) * 128]
            out_ref[...] = acc

        # Ranks of valid targets are < m_pad, so tiles whose first prediction
        # slot is >= m_pad can never receive a target: skip all selection work.
        needs_sel = n_idx * tile_n < m_pad

        @pl.when(needs_sel)
        def _():
            t = tgt_ref[...]                                  # (8, m_pad)
            row_sum = jnp.sum(t, axis=0, keepdims=True)       # (1, m_pad)
            valid = row_sum > 0.0
            vcount = valid.astype(jnp.int32)

            # Exclusive prefix count (rank) of valid targets along the M lanes
            # via a log2(m_pad)-step Hillis-Steele scan.  Direction-robust
            # w.r.t. pltpu.roll's rotation direction; runs on at most
            # ceil(m_pad/tile_n) tiles per batch, so its XLU cost is noise.
            idx = lax.broadcasted_iota(jnp.int32, (1, m_pad), 1)
            incl = vcount
            offset = 1
            while offset < m_pad:
                a = pltpu.roll(incl, shift=offset, axis=1)
                ia = pltpu.roll(idx, shift=offset, axis=1)
                b = pltpu.roll(incl, shift=m_pad - offset, axis=1)
                ib = pltpu.roll(idx, shift=m_pad - offset, axis=1)
                want = idx - offset
                shifted = jnp.where(ia == want, a, jnp.where(ib == want, b, 0))
                incl = incl + shifted
                offset *= 2
            rank = incl - vcount                              # exclusive count

            # One-hot selection for this tile's prediction slots; contracting
            # over M keeps the MXU output lane axis = N (lane dense).  Extra
            # valid targets (rank >= N) land in padded columns and are masked.
            n_iota = (lax.broadcasted_iota(jnp.int32, (tile_n, m_pad), 0)
                      + n_idx * tile_n)
            sel = jnp.where((rank == n_iota) & valid, 1.0, 0.0)
            y = lax.dot_general(t, sel, (((1,), (1,)), ((), ())),
                                preferred_element_type=jnp.float32)  # (8, tile_n)
            write_tile_loss(y)

        @pl.when(jnp.logical_not(needs_sel))
        def _():
            write_tile_loss(None)     # compacted targets are identically zero

    return kernel


def detection_loss(predictions, targets, max_tile_n=2048):
    """predictions: [B, N, 5], targets: [B, M, 5] -> scalar loss."""
    predictions = jnp.asarray(predictions, jnp.float32)
    targets = jnp.asarray(targets, jnp.float32)
    B, N, C = predictions.shape
    Bt, M, Ct = targets.shape
    assert C == C_IN and Ct == C_IN and Bt == B

    n_pad = _round_up(N, 128)
    m_pad = _round_up(M, 128)
    tile_n = _pick_tile_n(n_pad, m_pad, max_tile=max_tile_n)
    num_n_tiles = n_pad // tile_n

    # Layout plumbing: channel-major, lane-dense, channel padded 5 -> 8.
    # (XLA fuses transpose+pad into a single copy; see NOTE(perf) above.)
    pred_cm = jnp.pad(jnp.transpose(predictions, (0, 2, 1)),
                      ((0, 0), (0, C_PAD - C), (0, n_pad - N)))
    tgt_cm = jnp.pad(jnp.transpose(targets, (0, 2, 1)),
                     ((0, 0), (0, C_PAD - Ct), (0, m_pad - M)))

    kernel = _make_kernel(B, N, n_pad, m_pad, tile_n)

    n_sel_tiles = min(num_n_tiles, -(-m_pad // tile_n))
    cost = pl.CostEstimate(
        flops=int(B * (2 * C_PAD * m_pad * tile_n * n_sel_tiles
                       + 12 * C_PAD * n_pad)),
        transcendentals=int(B * 2 * C_PAD * n_pad),
        bytes_accessed=int(4 * (pred_cm.size + tgt_cm.size
                                + B * num_n_tiles * C_PAD * 128)),
    )

    partials = pl.pallas_call(
        kernel,
        out_shape=jax.ShapeDtypeStruct((B, num_n_tiles, C_PAD, 128), jnp.float32),
        grid_spec=pltpu.PrefetchScalarGridSpec(
            num_scalar_prefetch=0,
            grid=(B, num_n_tiles),
            in_specs=[
                pl.BlockSpec((None, C_PAD, tile_n), lambda b, n: (b, 0, n)),
                pl.BlockSpec((None, C_PAD, m_pad), lambda b, n: (b, 0, 0)),
            ],
            out_specs=pl.BlockSpec((None, None, C_PAD, 128),
                                   lambda b, n: (b, n, 0, 0)),
        ),
        compiler_params=pltpu.CompilerParams(
            dimension_semantics=("parallel", "parallel"),
            vmem_limit_bytes=32 * 1024 * 1024,
        ),
        cost_estimate=cost,
    )(pred_cm, tgt_cm)

    # Single cross-lane/sublane reduce, done once by XLA.
    return jnp.sum(partials)


def reference_loss(pred, tgt):
    """Pure numpy re-implementation of the PyTorch forward (for verification)."""
    pred = np.asarray(pred, dtype=np.float32)
    tgt = np.asarray(tgt, dtype=np.float32)
    B, N, _ = pred.shape
    pred_cls = pred[..., 0]
    pred_box = pred[..., 1:]
    target_cls = np.zeros_like(pred_cls)
    target_box = np.zeros_like(pred_box)
    for i in range(B):
        valid_mask = tgt[i].sum(axis=1) > 0
        valid_targets = tgt[i][valid_mask]
        if len(valid_targets) > 0:
            nv = min(len(valid_targets), N)
            target_cls[i, :nv] = valid_targets[:nv, 0]
            target_box[i, :nv] = valid_targets[:nv, 1:]
    x, y = pred_cls, target_cls
    bce = np.maximum(x, 0) - x * y + np.log1p(np.exp(-np.abs(x)))
    cls_loss = bce.mean()
    d = pred_box - target_box
    ad = np.abs(d)
    sl1 = np.where(ad < 1.0, 0.5 * d * d, ad - 0.5)
    box_loss = sl1.mean()
    return np.float32(cls_loss + box_loss)


if __name__ == "__main__":
    key = jax.random.PRNGKey(0)
    k1, k2, k3, k4 = jax.random.split(key, 4)

    # --- Test 1: module-typical small shapes -------------------------------
    B, N, M = 2, 16, 8
    predictions = jax.random.normal(k1, (B, N, 5), dtype=jnp.float32)
    raw = jax.random.uniform(k2, (B, M, 5), dtype=jnp.float32,
                             minval=0.1, maxval=1.0)
    valid_mask = jnp.array([[1, 0, 1, 1, 0, 1, 0, 1],
                            [0, 1, 1, 0, 0, 0, 1, 0]], dtype=jnp.float32)
    targets = raw * valid_mask[..., None]

    loss = jax.block_until_ready(detection_loss(predictions, targets))
    ref = reference_loss(predictions, targets)
    assert np.allclose(np.asarray(loss), ref, rtol=1e-5, atol=1e-5), (loss, ref)

    # --- Test 2: multi-tile grid (forces the tile-skip path + N-pad mask) ---
    B2, N2, M2 = 2, 300, 8
    predictions2 = jax.random.normal(k3, (B2, N2, 5), dtype=jnp.float32)
    raw2 = jax.random.uniform(k4, (B2, M2, 5), dtype=jnp.float32,
                              minval=0.1, maxval=1.0)
    valid_mask2 = jnp.array([[0, 1, 1, 0, 1, 0, 0, 1],
                             [1, 1, 0, 0, 0, 1, 1, 0]], dtype=jnp.float32)
    targets2 = raw2 * valid_mask2[..., None]

    loss2 = jax.block_until_ready(
        detection_loss(predictions2, targets2, max_tile_n=128))
    ref2 = reference_loss(predictions2, targets2)
    assert np.allclose(np.asarray(loss2), ref2, rtol=1e-5, atol=1e-5), (loss2, ref2)

    print("KERNEL_OK")
</pallas_src>

<mosaic_0001>
module attributes {stable_mosaic.version = 11 : i64} {
  func.func @kernel(%arg0: i32, %arg1: i32, %arg2: memref<1x8x128xf32, #tpu.memory_space<vmem>>, %arg3: memref<1x8x128xf32, #tpu.memory_space<vmem>>, %arg4: memref<1x1x8x128xf32, #tpu.memory_space<vmem>>) attributes {dimension_semantics = [#tpu.dimension_semantics<parallel>, #tpu.dimension_semantics<parallel>], iteration_bounds = array<i64: 2, 1>, scalar_prefetch = 0 : i64, scratch_operands = 0 : i64, tpu.core_type = #tpu.core_type<tc>, window_params = [{transform_indices = @transform_0, window_bounds = array<i64: 1, 8, 128>}, {transform_indices = @transform_1, window_bounds = array<i64: 1, 8, 128>}, {transform_indices = @transform_2, window_bounds = array<i64: 1, 1, 8, 128>}]} {
    %0 = tpu.iota {dimensions = array<i32: 0>} : vector<8x1xi32>
    %c0_i32 = arith.constant 0 : i32
    %1 = vector.broadcast %c0_i32 : i32 to vector<8x1xi32>
    %2 = arith.cmpi eq, %0, %1 : vector<8x1xi32>
    %cst = arith.constant 3.125000e-02 : f32
    %cst_0 = arith.constant 0.000000e+00 : f32
    %3 = vector.broadcast %cst : f32 to vector<8x1xf32>
    %4 = vector.broadcast %cst_0 : f32 to vector<8x1xf32>
    %5 = arith.select %2, %3, %4 : vector<8x1xi1>, vector<8x1xf32>
    %c1_i32 = arith.constant 1 : i32
    %6 = vector.broadcast %c1_i32 : i32 to vector<8x1xi32>
    %7 = arith.cmpi sge, %0, %6 : vector<8x1xi32>
    %c5_i32 = arith.constant 5 : i32
    %8 = vector.broadcast %c5_i32 : i32 to vector<8x1xi32>
    %9 = arith.cmpi slt, %0, %8 : vector<8x1xi32>
    %10 = arith.andi %7, %9 : vector<8x1xi1>
    %cst_1 = arith.constant 7.812500e-03 : f32
    %cst_2 = arith.constant 0.000000e+00 : f32
    %11 = vector.broadcast %cst_1 : f32 to vector<8x1xf32>
    %12 = vector.broadcast %cst_2 : f32 to vector<8x1xf32>
    %13 = arith.select %10, %11, %12 : vector<8x1xi1>, vector<8x1xf32>
    %c0 = arith.constant 0 : index
    %c0_3 = arith.constant 0 : index
    %c0_4 = arith.constant 0 : index
    %14 = vector.load %arg2[%c0, %c0_3, %c0_4] : memref<1x8x128xf32, #tpu.memory_space<vmem>>, vector<1x8x128xf32>
    %15 = vector.shape_cast %14 : vector<1x8x128xf32> to vector<8x128xf32>
    %c128_i32 = arith.constant 128 : i32
    %16 = arith.muli %arg1, %c128_i32 : i32
    %c128_i32_5 = arith.constant 128 : i32
    %17 = arith.cmpi slt, %16, %c128_i32_5 : i32
    %18 = arith.extui %17 : i1 to i32
    %c0_i32_6 = arith.constant 0 : i32
    %19 = arith.cmpi ne, %18, %c0_i32_6 : i32
    scf.if %19 {
      %c0_8 = arith.constant 0 : index
      %c0_9 = arith.constant 0 : index
      %c0_10 = arith.constant 0 : index
      %23 = vector.load %arg3[%c0_8, %c0_9, %c0_10] : memref<1x8x128xf32, #tpu.memory_space<vmem>>, vector<1x8x128xf32>
      %24 = vector.shape_cast %23 : vector<1x8x128xf32> to vector<8x128xf32>
      %cst_11 = arith.constant dense<0.000000e+00> : vector<128xf32>
      %25 = vector.multi_reduction <add>, %24, %cst_11 [0] : vector<8x128xf32> to vector<128xf32>
      %26 = vector.shape_cast %25 : vector<128xf32> to vector<1x128xf32>
      %cst_12 = arith.constant 0.000000e+00 : f32
      %27 = vector.broadcast %cst_12 : f32 to vector<1x128xf32>
      %28 = arith.cmpf ogt, %26, %27 : vector<1x128xf32>
      %29 = arith.extui %28 : vector<1x128xi1> to vector<1x128xi32>
      %30 = tpu.iota {dimensions = array<i32: 1>} : vector<1x128xi32>
      %c1_i32_13 = arith.constant 1 : i32
      %31 = tpu.dynamic_rotate %29 by %c1_i32_13 dim 1 : vector<1x128xi32>, i32 -> vector<1x128xi32>
      %c1_i32_14 = arith.constant 1 : i32
      %32 = tpu.dynamic_rotate %30 by %c1_i32_14 dim 1 : vector<1x128xi32>, i32 -> vector<1x128xi32>
      %c127_i32 = arith.constant 127 : i32
      %33 = tpu.dynamic_rotate %29 by %c127_i32 dim 1 : vector<1x128xi32>, i32 -> vector<1x128xi32>
      %c127_i32_15 = arith.constant 127 : i32
      %34 = tpu.dynamic_rotate %30 by %c127_i32_15 dim 1 : vector<1x128xi32>, i32 -> vector<1x128xi32>
      %c1_i32_16 = arith.constant 1 : i32
      %35 = vector.broadcast %c1_i32_16 : i32 to vector<1x128xi32>
      %36 = arith.subi %30, %35 : vector<1x128xi32>
      %37 = arith.cmpi eq, %32, %36 : vector<1x128xi32>
      %38 = arith.cmpi eq, %34, %36 : vector<1x128xi32>
      %c0_i32_17 = arith.constant 0 : i32
      %39 = vector.broadcast %c0_i32_17 : i32 to vector<1x128xi32>
      %40 = arith.select %38, %33, %39 : vector<1x128xi1>, vector<1x128xi32>
      %41 = arith.select %37, %31, %40 : vector<1x128xi1>, vector<1x128xi32>
      %42 = arith.addi %29, %41 : vector<1x128xi32>
      %c2_i32 = arith.constant 2 : i32
      %43 = tpu.dynamic_rotate %42 by %c2_i32 dim 1 : vector<1x128xi32>, i32 -> vector<1x128xi32>
      %c2_i32_18 = arith.constant 2 : i32
      %44 = tpu.dynamic_rotate %30 by %c2_i32_18 dim 1 : vector<1x128xi32>, i32 -> vector<1x128xi32>
      %c126_i32 = arith.constant 126 : i32
      %45 = tpu.dynamic_rotate %42 by %c126_i32 dim 1 : vector<1x128xi32>, i32 -> vector<1x128xi32>
      %c126_i32_19 = arith.constant 126 : i32
      %46 = tpu.dynamic_rotate %30 by %c126_i32_19 dim 1 : vector<1x128xi32>, i32 -> vector<1x128xi32>
      %c2_i32_20 = arith.constant 2 : i32
      %47 = vector.broadcast %c2_i32_20 : i32 to vector<1x128xi32>
      %48 = arith.subi %30, %47 : vector<1x128xi32>
      %49 = arith.cmpi eq, %44, %48 : vector<1x128xi32>
      %50 = arith.cmpi eq, %46, %48 : vector<1x128xi32>
      %c0_i32_21 = arith.constant 0 : i32
      %51 = vector.broadcast %c0_i32_21 : i32 to vector<1x128xi32>
      %52 = arith.select %50, %45, %51 : vector<1x128xi1>, vector<1x128xi32>
      %53 = arith.select %49, %43, %52 : vector<1x128xi1>, vector<1x128xi32>
      %54 = arith.addi %42, %53 : vector<1x128xi32>
      %c4_i32 = arith.constant 4 : i32
      %55 = tpu.dynamic_rotate %54 by %c4_i32 dim 1 : vector<1x128xi32>, i32 -> vector<1x128xi32>
      %c4_i32_22 = arith.constant 4 : i32
      %56 = tpu.dynamic_rotate %30 by %c4_i32_22 dim 1 : vector<1x128xi32>, i32 -> vector<1x128xi32>
      %c124_i32 = arith.constant 124 : i32
      %57 = tpu.dynamic_rotate %54 by %c124_i32 dim 1 : vector<1x128xi32>, i32 -> vector<1x128xi32>
      %c124_i32_23 = arith.constant 124 : i32
      %58 = tpu.dynamic_rotate %30 by %c124_i32_23 dim 1 : vector<1x128xi32>, i32 -> vector<1x128xi32>
      %c4_i32_24 = arith.constant 4 : i32
      %59 = vector.broadcast %c4_i32_24 : i32 to vector<1x128xi32>
      %60 = arith.subi %30, %59 : vector<1x128xi32>
      %61 = arith.cmpi eq, %56, %60 : vector<1x128xi32>
      %62 = arith.cmpi eq, %58, %60 : vector<1x128xi32>
      %c0_i32_25 = arith.constant 0 : i32
      %63 = vector.broadcast %c0_i32_25 : i32 to vector<1x128xi32>
      %64 = arith.select %62, %57, %63 : vector<1x128xi1>, vector<1x128xi32>
      %65 = arith.select %61, %55, %64 : vector<1x128xi1>, vector<1x128xi32>
      %66 = arith.addi %54, %65 : vector<1x128xi32>
      %c8_i32 = arith.constant 8 : i32
      %67 = tpu.dynamic_rotate %66 by %c8_i32 dim 1 : vector<1x128xi32>, i32 -> vector<1x128xi32>
      %c8_i32_26 = arith.constant 8 : i32
      %68 = tpu.dynamic_rotate %30 by %c8_i32_26 dim 1 : vector<1x128xi32>, i32 -> vector<1x128xi32>
      %c120_i32 = arith.constant 120 : i32
      %69 = tpu.dynamic_rotate %66 by %c120_i32 dim 1 : vector<1x128xi32>, i32 -> vector<1x128xi32>
      %c120_i32_27 = arith.constant 120 : i32
      %70 = tpu.dynamic_rotate %30 by %c120_i32_27 dim 1 : vector<1x128xi32>, i32 -> vector<1x128xi32>
      %c8_i32_28 = arith.constant 8 : i32
      %71 = vector.broadcast %c8_i32_28 : i32 to vector<1x128xi32>
      %72 = arith.subi %30, %71 : vector<1x128xi32>
      %73 = arith.cmpi eq, %68, %72 : vector<1x128xi32>
      %74 = arith.cmpi eq, %70, %72 : vector<1x128xi32>
      %c0_i32_29 = arith.constant 0 : i32
      %75 = vector.broadcast %c0_i32_29 : i32 to vector<1x128xi32>
      %76 = arith.select %74, %69, %75 : vector<1x128xi1>, vector<1x128xi32>
      %77 = arith.select %73, %67, %76 : vector<1x128xi1>, vector<1x128xi32>
      %78 = arith.addi %66, %77 : vector<1x128xi32>
      %c16_i32 = arith.constant 16 : i32
      %79 = tpu.dynamic_rotate %78 by %c16_i32 dim 1 : vector<1x128xi32>, i32 -> vector<1x128xi32>
      %c16_i32_30 = arith.constant 16 : i32
      %80 = tpu.dynamic_rotate %30 by %c16_i32_30 dim 1 : vector<1x128xi32>, i32 -> vector<1x128xi32>
      %c112_i32 = arith.constant 112 : i32
      %81 = tpu.dynamic_rotate %78 by %c112_i32 dim 1 : vector<1x128xi32>, i32 -> vector<1x128xi32>
      %c112_i32_31 = arith.constant 112 : i32
      %82 = tpu.dynamic_rotate %30 by %c112_i32_31 dim 1 : vector<1x128xi32>, i32 -> vector<1x128xi32>
      %c16_i32_32 = arith.constant 16 : i32
      %83 = vector.broadcast %c16_i32_32 : i32 to vector<1x128xi32>
      %84 = arith.subi %30, %83 : vector<1x128xi32>
      %85 = arith.cmpi eq, %80, %84 : vector<1x128xi32>
      %86 = arith.cmpi eq, %82, %84 : vector<1x128xi32>
      %c0_i32_33 = arith.constant 0 : i32
      %87 = vector.broadcast %c0_i32_33 : i32 to vector<1x128xi32>
      %88 = arith.select %86, %81, %87 : vector<1x128xi1>, vector<1x128xi32>
      %89 = arith.select %85, %79, %88 : vector<1x128xi1>, vector<1x128xi32>
      %90 = arith.addi %78, %89 : vector<1x128xi32>
      %c32_i32 = arith.constant 32 : i32
      %91 = tpu.dynamic_rotate %90 by %c32_i32 dim 1 : vector<1x128xi32>, i32 -> vector<1x128xi32>
      %c32_i32_34 = arith.constant 32 : i32
      %92 = tpu.dynamic_rotate %30 by %c32_i32_34 dim 1 : vector<1x128xi32>, i32 -> vector<1x128xi32>
      %c96_i32 = arith.constant 96 : i32
      %93 = tpu.dynamic_rotate %90 by %c96_i32 dim 1 : vector<1x128xi32>, i32 -> vector<1x128xi32>
      %c96_i32_35 = arith.constant 96 : i32
      %94 = tpu.dynamic_rotate %30 by %c96_i32_35 dim 1 : vector<1x128xi32>, i32 -> vector<1x128xi32>
      %c32_i32_36 = arith.constant 32 : i32
      %95 = vector.broadcast %c32_i32_36 : i32 to vector<1x128xi32>
      %96 = arith.subi %30, %95 : vector<1x128xi32>
      %97 = arith.cmpi eq, %92, %96 : vector<1x128xi32>
      %98 = arith.cmpi eq, %94, %96 : vector<1x128xi32>
      %c0_i32_37 = arith.constant 0 : i32
      %99 = vector.broadcast %c0_i32_37 : i32 to vector<1x128xi32>
      %100 = arith.select %98, %93, %99 : vector<1x128xi1>, vector<1x128xi32>
      %101 = arith.select %97, %91, %100 : vector<1x128xi1>, vector<1x128xi32>
      %102 = arith.addi %90, %101 : vector<1x128xi32>
      %c64_i32 = arith.constant 64 : i32
      %103 = tpu.dynamic_rotate %102 by %c64_i32 dim 1 : vector<1x128xi32>, i32 -> vector<1x128xi32>
      %c64_i32_38 = arith.constant 64 : i32
      %104 = tpu.dynamic_rotate %30 by %c64_i32_38 dim 1 : vector<1x128xi32>, i32 -> vector<1x128xi32>
      %c64_i32_39 = arith.constant 64 : i32
      %105 = tpu.dynamic_rotate %102 by %c64_i32_39 dim 1 : vector<1x128xi32>, i32 -> vector<1x128xi32>
      %c64_i32_40 = arith.constant 64 : i32
      %106 = tpu.dynamic_rotate %30 by %c64_i32_40 dim 1 : vector<1x128xi32>, i32 -> vector<1x128xi32>
      %c64_i32_41 = arith.constant 64 : i32
      %107 = vector.broadcast %c64_i32_41 : i32 to vector<1x128xi32>
      %108 = arith.subi %30, %107 : vector<1x128xi32>
      %109 = arith.cmpi eq, %104, %108 : vector<1x128xi32>
      %110 = arith.cmpi eq, %106, %108 : vector<1x128xi32>
      %c0_i32_42 = arith.constant 0 : i32
      %111 = vector.broadcast %c0_i32_42 : i32 to vector<1x128xi32>
      %112 = arith.select %110, %105, %111 : vector<1x128xi1>, vector<1x128xi32>
      %113 = arith.select %109, %103, %112 : vector<1x128xi1>, vector<1x128xi32>
      %114 = arith.addi %102, %113 : vector<1x128xi32>
      %115 = arith.subi %114, %29 : vector<1x128xi32>
      %116 = tpu.iota {dimensions = array<i32: 0>} : vector<128x128xi32>
      %c128_i32_43 = arith.constant 128 : i32
      %117 = arith.muli %arg1, %c128_i32_43 : i32
      %118 = vector.broadcast %117 : i32 to vector<128x128xi32>
      %119 = arith.addi %116, %118 : vector<128x128xi32>
      %120 = vector.broadcast %115 : vector<1x128xi32> to vector<128x128xi32>
      %121 = arith.cmpi eq, %120, %119 : vector<128x128xi32>
      %122 = vector.broadcast %28 : vector<1x128xi1> to vector<128x128xi1>
      %123 = arith.andi %121, %122 : vector<128x128xi1>
      %cst_44 = arith.constant 1.000000e+00 : f32
      %cst_45 = arith.constant 0.000000e+00 : f32
      %124 = vector.broadcast %cst_44 : f32 to vector<128x128xf32>
      %125 = vector.broadcast %cst_45 : f32 to vector<128x128xf32>
      %126 = arith.select %123, %124, %125 : vector<128x128xi1>, vector<128x128xf32>
      %cst_46 = arith.constant dense<0.000000e+00> : vector<8x128xf32>
      %127 = tpu.matmul %24, %126, %cst_46 {dimension_numbers = #tpu.dot_dimension_numbers<[1], [1], [0], [0], [0, 0, 1, 0], [], []>} : vector<8x128xf32>, vector<128x128xf32>, vector<8x128xf32> -> vector<8x128xf32>
      %cst_47 = arith.constant 0.000000e+00 : f32
      %128 = vector.broadcast %cst_47 : f32 to vector<8x128xf32>
      %129 = arith.maximumf %15, %128 : vector<8x128xf32>
      %130 = arith.mulf %15, %127 : vector<8x128xf32>
      %131 = arith.subf %129, %130 : vector<8x128xf32>
      %132 = math.absf %15 : vector<8x128xf32>
      %cst_48 = arith.constant 0.000000e+00 : f32
      %133 = vector.broadcast %cst_48 : f32 to vector<8x128xf32>
      %134 = arith.subf %133, %132 : vector<8x128xf32>
      %135 = math.exp %134 : vector<8x128xf32>
      %136 = math.log1p %135 : vector<8x128xf32>
      %137 = arith.addf %131, %136 : vector<8x128xf32>
      %138 = arith.subf %15, %127 : vector<8x128xf32>
      %139 = math.absf %138 : vector<8x128xf32>
      %cst_49 = arith.constant 1.000000e+00 : f32
      %140 = vector.broadcast %cst_49 : f32 to vector<8x128xf32>
      %141 = arith.cmpf olt, %139, %140 : vector<8x128xf32>
      %cst_50 = arith.constant 5.000000e-01 : f32
      %142 = vector.broadcast %cst_50 : f32 to vector<8x128xf32>
      %143 = arith.mulf %142, %138 : vector<8x128xf32>
      %144 = arith.mulf %143, %138 : vector<8x128xf32>
      %cst_51 = arith.constant 5.000000e-01 : f32
      %145 = vector.broadcast %cst_51 : f32 to vector<8x128xf32>
      %146 = arith.subf %139, %145 : vector<8x128xf32>
      %147 = arith.select %141, %144, %146 : vector<8x128xi1>, vector<8x128xf32>
      %148 = vector.broadcast %5 : vector<8x1xf32> to vector<8x128xf32>
      %149 = arith.mulf %137, %148 : vector<8x128xf32>
      %150 = vector.broadcast %13 : vector<8x1xf32> to vector<8x128xf32>
      %151 = arith.mulf %147, %150 : vector<8x128xf32>
      %152 = arith.addf %149, %151 : vector<8x128xf32>
      %153 = tpu.iota {dimensions = array<i32: 1>} : vector<8x128xi32>
      %c128_i32_52 = arith.constant 128 : i32
      %154 = arith.muli %arg1, %c128_i32_52 : i32
      %155 = vector.broadcast %154 : i32 to vector<8x128xi32>
      %156 = arith.addi %153, %155 : vector<8x128xi32>
      %c16_i32_53 = arith.constant 16 : i32
      %157 = vector.broadcast %c16_i32_53 : i32 to vector<8x128xi32>
      %158 = arith.cmpi slt, %156, %157 : vector<8x128xi32>
      %cst_54 = arith.constant 0.000000e+00 : f32
      %159 = vector.broadcast %cst_54 : f32 to vector<8x128xf32>
      %160 = arith.select %158, %152, %159 : vector<8x128xi1>, vector<8x128xf32>
      %c0_55 = arith.constant 0 : index
      %c0_56 = arith.constant 0 : index
      %c0_57 = arith.constant 0 : index
      %c0_58 = arith.constant 0 : index
      %161 = vector.load %arg4[%c0_55, %c0_56, %c0_57, %c0_58] : memref<1x1x8x128xf32, #tpu.memory_space<vmem>>, vector<1x1x8x128xf32>
      %162 = vector.shape_cast %161 : vector<1x1x8x128xf32> to vector<8x128xf32>
      %163 = vector.shape_cast %160 : vector<8x128xf32> to vector<1x1x8x128xf32>
      tpu.vector_store %arg4[%c0_55, %c0_56, %c0_57, %c0_58], %163 {strides = array<i32>} : memref<1x1x8x128xf32, #tpu.memory_space<vmem>>, vector<1x1x8x128xf32>,
    } else {
    }
    %true = arith.constant true
    %20 = arith.xori %17, %true : i1
    %21 = arith.extui %20 : i1 to i32
    %c0_i32_7 = arith.constant 0 : i32
    %22 = arith.cmpi ne, %21, %c0_i32_7 : i32
    scf.if %22 {
      %cst_8 = arith.constant 0.000000e+00 : f32
      %23 = vector.broadcast %cst_8 : f32 to vector<8x128xf32>
      %24 = arith.maximumf %15, %23 : vector<8x128xf32>
      %25 = math.absf %15 : vector<8x128xf32>
      %cst_9 = arith.constant 0.000000e+00 : f32
      %26 = vector.broadcast %cst_9 : f32 to vector<8x128xf32>
      %27 = arith.subf %26, %25 : vector<8x128xf32>
      %28 = math.exp %27 : vector<8x128xf32>
      %29 = math.log1p %28 : vector<8x128xf32>
      %30 = arith.addf %24, %29 : vector<8x128xf32>
      %31 = math.absf %15 : vector<8x128xf32>
      %cst_10 = arith.constant 1.000000e+00 : f32
      %32 = vector.broadcast %cst_10 : f32 to vector<8x128xf32>
      %33 = arith.cmpf olt, %31, %32 : vector<8x128xf32>
      %cst_11 = arith.constant 5.000000e-01 : f32
      %34 = vector.broadcast %cst_11 : f32 to vector<8x128xf32>
      %35 = arith.mulf %34, %15 : vector<8x128xf32>
      %36 = arith.mulf %35, %15 : vector<8x128xf32>
      %cst_12 = arith.constant 5.000000e-01 : f32
      %37 = vector.broadcast %cst_12 : f32 to vector<8x128xf32>
      %38 = arith.subf %31, %37 : vector<8x128xf32>
      %39 = arith.select %33, %36, %38 : vector<8x128xi1>, vector<8x128xf32>
      %40 = vector.broadcast %5 : vector<8x1xf32> to vector<8x128xf32>
      %41 = arith.mulf %30, %40 : vector<8x128xf32>
      %42 = vector.broadcast %13 : vector<8x1xf32> to vector<8x128xf32>
      %43 = arith.mulf %39, %42 : vector<8x128xf32>
      %44 = arith.addf %41, %43 : vector<8x128xf32>
      %45 = tpu.iota {dimensions = array<i32: 1>} : vector<8x128xi32>
      %c128_i32_13 = arith.constant 128 : i32
      %46 = arith.muli %arg1, %c128_i32_13 : i32
      %47 = vector.broadcast %46 : i32 to vector<8x128xi32>
      %48 = arith.addi %45, %47 : vector<8x128xi32>
      %c16_i32 = arith.constant 16 : i32
      %49 = vector.broadcast %c16_i32 : i32 to vector<8x128xi32>
      %50 = arith.cmpi slt, %48, %49 : vector<8x128xi32>
      %cst_14 = arith.constant 0.000000e+00 : f32
      %51 = vector.broadcast %cst_14 : f32 to vector<8x128xf32>
      %52 = arith.select %50, %44, %51 : vector<8x128xi1>, vector<8x128xf32>
      %c0_15 = arith.constant 0 : index
      %c0_16 = arith.constant 0 : index
      %c0_17 = arith.constant 0 : index
      %c0_18 = arith.constant 0 : index
      %53 = vector.load %arg4[%c0_15, %c0_16, %c0_17, %c0_18] : memref<1x1x8x128xf32, #tpu.memory_space<vmem>>, vector<1x1x8x128xf32>
      %54 = vector.shape_cast %53 : vector<1x1x8x128xf32> to vector<8x128xf32>
      %55 = vector.shape_cast %52 : vector<8x128xf32> to vector<1x1x8x128xf32>
      tpu.vector_store %arg4[%c0_15, %c0_16, %c0_17, %c0_18], %55 {strides = array<i32>} : memref<1x1x8x128xf32, #tpu.memory_space<vmem>>, vector<1x1x8x128xf32>,
    } else {
    }
    return
  }
  func.func @transform_0(%arg0: i32, %arg1: i32) -> (i32, i32, i32) {
    %c0_i32 = arith.constant 0 : i32
    %c0_i32_0 = arith.constant 0 : i32
    return %arg0, %c0_i32, %arg1 : i32, i32, i32
  }
  func.func @transform_1(%arg0: i32, %arg1: i32) -> (i32, i32, i32) {
    %c0_i32 = arith.constant 0 : i32
    %c0_i32_0 = arith.constant 0 : i32
    %c0_i32_1 = arith.constant 0 : i32
    return %arg0, %c0_i32, %c0_i32_0 : i32, i32, i32
  }
  func.func @transform_2(%arg0: i32, %arg1: i32) -> (i32, i32, i32, i32) {
    %c0_i32 = arith.constant 0 : i32
    %c0_i32_0 = arith.constant 0 : i32
    %c0_i32_1 = arith.constant 0 : i32
    return %arg0, %arg1, %c0_i32, %c0_i32_0 : i32, i32, i32, i32
  }
}

</mosaic_0001>

<bundles_post_ra>
// kernel: tpu_custom_call.1
= control target key start
LH: loop header
LB: loop body
LE: loop exit
PB: predicated region body
PF: predicated region fallthrough
CT: control target
= control target key end

     0   :  { %7 = vsyncpa [#allocation3], 0  ;;  %s1158_s0 = inlined_call_operand.hbm [shape: f32[2,8,128], index: 0, kind: input, shape index: {}]   ;;  %s1159_s1 = inlined_call_operand.hbm [shape: f32[2,8,128], index: 1, kind: input, shape index: {}]   ;;  %s1160_s2 = inlined_call_operand.hbm [shape: f32[2,1,8,128], index: 2, kind: output, shape index: {}]  }
   0x1   :  { %9 = vsyncpa [#allocation3 + $0x1], 0 }
   0x2   :  { %10 = vsyncpa [#allocation6], 0 }
   0x3   :  { %12 = vsyncpa [#allocation6 + $0x1], 0 }
   0x4   :  { %13 = vsyncpa [#allocation4], 0 }
   0x5   :  { %15 = vsyncpa [#allocation4 + $0x1], 0  ;;  %s929_s9 = smov 0   ;;  %s931_s10 = smov 0  }
   0x6   :  { %s933_s11 = smov 0   ;;  %s935_s12 = smov 0  }
   0x7   :  { %s937_s13 = smov 0   ;;  %s939_s14 = smov 0  }
   0x8 LB: > { %s622_s15 = sadd.s32 4294967295, %s896_s14   ;;  %s623_s16 = sadd.s32 4294967294, %s896_s14   ;;  %s896_s14 = sphi %s939_s14, %s21_s14   ;;  %s892_s13 = sphi %s937_s13, %s1169_s13   ;;  %s888_s12 = sphi %s935_s12, %s1168_s12   ;;  %s884_s11 = sphi %s933_s11, %s1167_s11   ;;  %s880_s10 = sphi %s931_s10, %s1166_s10   ;;  %s876_s9 = sphi %s929_s9, %s1165_s9  }
   0x9   : > { %s33_s17 = sadd.s32 1, %s892_s13  ;;  %s42_s18 = sadd.s32 1, %s884_s11 }
   0xa   : > { %p35_p0 = scmp.ge.s32.totalorder %s33_s17, 2  ;;  %p49_p1 = scmp.ne.s32.totalorder %s884_s11, %s880_s10 }
   0xb   : > { %p50_p2 = scmp.eq.s32.totalorder %s896_s14, 0  ;;  %p55_p3 = scmp.ne.s32.totalorder %s880_s10, %s876_s9 }
   0xc   : > { %s1171_s17 = smov (%p35_p0, %s33_s17), 0  ;;  %p56_p5 = scmp.eq.s32.totalorder %s622_s15, 0 }
   0xd   : > { %p970_p4 = por %p50_p2, %p49_p1  ;;  %s37_s20 = ssub.s32 %s892_s13, %s1171_s17 }
   0xe   : > { %p107_p6 = scmp.eq.s32.totalorder %s622_s15, 1  ;;  %p40_p7 = scmp.eq.s32.totalorder %s37_s20, 0 }
   0xf   : > { %p976_p8 = por %p56_p5, %p55_p3  ;;  %p113_p10 = scmp.eq.s32.totalorder %s623_s16, 1 }
  0x10   : > { %p980_p9 = por %p107_p6, %p49_p1  ;;  %p625_p12 = scmp.ge.s32.totalorder %s896_s14, 2 }
  0x11   : > { %s985_s23 = scalar_select %p40_p7, %s884_s11, %s42_s18  }
  0x12   : > { %p987_p11 = por %p113_p10, %p55_p3  ;;  %p680_p13 = scmp.lt.s32.totalorder %s896_s14, 2 }
  0x13   : > { %s133_s25 = sand.u32 1, %s884_s11   ;;  %s627_s27 = sshll.u32 %s892_s13, 3 }
  0x14   : > { %s626_s26 = sshll.u32 %s133_s25, 3  ;;  %s142_s30 = scalar_lea.hbm %s1158_s0, %s627_s27 }
  0x15   : > { %s137_s3 = scalar_lea.vmem [#allocation2], %s626_s26  ;;  %s144_s5 = sshll.u32 %s142_s30, 4  ;;  %s145_s5 = int_to_ptr.hbm [resolvable:$true] %s144_s5 }
  0x16   : > { %s146_s4 = sshll.u32 %s137_s3, 4  ;;  %p670_p0 = pnand %p680_p13, %p970_p4  ;;  %s147_s4 = int_to_ptr.vmem [resolvable:$true] %s146_s4 }
  0x17   : > { %p630_p1 = scmp.ge.s32.totalorder %s896_s14, 1  ;;  %p170_p2 = scmp.lt.s32.totalorder %s896_s14, 3 }
  0x18   : > { %s134_s6 = scalar_lea.sflag [#allocation3], %s133_s25  ;;  %s161_s15 = scalar_lea.hbm %s1159_s1, %s627_s27 }
  0x19   : > { %672 = dma.hbm_to_vmem [thread:$0]  (!%p670_p0), %s145_s5, 128, %s147_s4, %s134_s6  }
  0x1a   : > { %p171_p3 = pnand %p630_p1, %p170_p2  ;;  %s157_s16 = scalar_lea.vmem [#allocation5], %s626_s26 }
  0x1b   : > { %s165_s18 = sshll.u32 %s157_s16, 4  ;;  %s163_s20 = sshll.u32 %s161_s15, 4  ;;  %s166_s18 = int_to_ptr.vmem [resolvable:$true] %s165_s18  ;;  %s164_s20 = int_to_ptr.hbm [resolvable:$true] %s163_s20 }
  0x1c   : > { %s154_s28 = scalar_lea.sflag [#allocation6], %s133_s25  ;;  %174 = sbr.rel (%p171_p3) target bundleno = 1099 (0x44b), region = 28 }
  0x1d   : > { %675 = dma.hbm_to_vmem [thread:$0]  (!%p670_p0), %s164_s20, 128, %s166_s18, %s154_s28  }
  0x1e   : > { %s1006_s19 = sand.u32 (!%p171_p3), 1, %s880_s10  }
  0x1f   : > { %s1009_s29 = sshll.u32 (!%p171_p3), %s1006_s19, 3  ;;  %s177_s30 = scalar_lea.sflag (!%p171_p3), [#allocation3], %s1006_s19 }
  0x20   : > { %s180_s3 = scalar_lea.vmem (!%p171_p3), [#allocation2], %s1009_s29 }
  0x21   : > { %863 = dma.done.wait (%p976_p8), %s177_s30, 128  }
  0x22   : > { %865 = vsyncadd (%p976_p8), %s177_s30, 4294967168  ;;  %s187_s25 = scalar_lea.sflag [#allocation6], %s1006_s19  ;;  %s190_s26 = scalar_lea.vmem [#allocation5], %s1009_s29 }
  0x23   : > { %867 = dma.done.wait (%p976_p8), %s187_s25, 128  }
  0x24   : > { %869 = vsyncadd (%p976_p8), %s187_s25, 4294967168  ;;  %v217_v0 = vlaneseq  ;;  %s898_s27 = smov 127   ;;  %v1027_v2 = vld [vmem:[%s190_s26] sm:$0xff]  ;;  %s899_s4 = smov 1   ;;  %v901_v9 = vmov 0  }
  0x25   : > { %v232_v3 = vrot.slane %v1027_v2, 4  ;;  %s900_s21 = smov 126   ;;  %s902_s5 = smov 2  }
  0x26   : > { %v1024_v1 = vand.u32 127, %v217_v0  ;;  %s903_s6 = smov 124   ;;  %s904_s7 = smov 4   ;;  %v1061_v62 = vshrl.u32 %v217_v0, 7 }
  0x27   : > { %v233_v4 = vadd.f32 %v232_v3, %v1027_v2  ;;  %s905_s8 = smov 120   ;;  %s906_s15 = smov 8  }
  0x28   : > { %248 = vrot.lane.b32.xlu0 %v1024_v1, %s898_s27  ;;  %262 = vrot.lane.b32.xlu2 %v1024_v1, %s900_s21  ;;  %v634_v13 = vadd.s32 4294967295, %v1024_v1  ;;  %v635_v20 = vadd.s32 4294967294, %v1024_v1  ;;  %s907_s16 = smov 112   ;;  %v636_v28 = vadd.s32 4294967292, %v1024_v1  ;;  %s908_s18 = smov 16   ;;  %v637_v36 = vadd.s32 4294967288, %v1024_v1 }
  0x29   : > { %v234_v5 = vrot.slane %v233_v4, 2  ;;  %s909_s20 = smov 96   ;;  %s910_s28 = smov 32   ;;  %v638_v44 = vadd.s32 4294967280, %v1024_v1  ;;  %v639_v52 = vadd.s32 4294967264, %v1024_v1  ;;  %v640_v59 = vadd.s32 4294967232, %v1024_v1 }
  0x2a   : > { %s911_s30 = smov 64   ;;  %v346_v0 = vadd.s32 96, %v1061_v62 }
  0x2b   : > { %v235_v6 = vadd.f32 %v234_v5, %v233_v4  ;;  %v349_v5 = vadd.s32 120, %v1061_v62 }
  0x2d   : > { %v236_v7 = vrot.slane %v235_v6, 1 }
  0x2f   : > { %v1032_v8 = vadd.f32 %v236_v7, %v235_v6  ;;  %v348_v7 = vadd.s32 112, %v1061_v62 }
  0x30   : > { %244 = vrot.lane.b32.xlu0 %v1024_v1, %s899_s4  ;;  %258 = vrot.lane.b32.xlu2 %v1024_v1, %s902_s5 }
  0x31   : > { %vm238_vm0 = vcmp.gt.f32.partialorder %v1032_v8, 0.0 }
  0x32   : > { %v1038_v10 = vsel %vm238_vm0, 1, %v901_v9  ;;  %v912_v9 = vmov 1.0  }
  0x33   : > { %246 = vrot.lane.b32.xlu1 %v1038_v10, %s898_s27 }
  0x38   : > { %276 = vrot.lane.b32.xlu2 %v1024_v1, %s903_s6 }
  0x3b   : > { %242 = vrot.lane.b32.xlu1 %v1038_v10, %s899_s4 }
  0x82   : > { %v263_v19 = vpop.permute.xlu2 %262 }
  0x83   : > { %vm266_vm4 = vcmp.eq.s32.totalorder %v263_v19, %v635_v20  ;;  %v337_v19 = vadd.s32 24, %v1061_v62 }
  0x8a   : > { %v259_v21 = vpop.permute.xlu2 %258 }
  0x8b   : > { %vm265_vm3 = vcmp.eq.s32.totalorder %v259_v21, %v635_v20  ;;  %v336_v20 = vadd.s32 16, %v1061_v62  ;;  %v335_v21 = vadd.s32 8, %v1061_v62 }
  0x92   : > { %v277_v27 = vpop.permute.xlu2 %276 }
  0x93   : > { %vm280_vm6 = vcmp.eq.s32.totalorder %v277_v27, %v636_v28 }
  0x9a   : > { %v249_v11 = vpop.permute.xlu0 %248 }
  0x9b   : > { %vm252_vm1 = vcmp.eq.s32.totalorder %v249_v11, %v634_v13  ;;  %v347_v11 = vadd.s32 104, %v1061_v62 }
  0xa2   : > { %v245_v14 = vpop.permute.xlu0 %244 }
  0xa3   : > { %vm251_vm2 = vcmp.eq.s32.totalorder %v245_v14, %v634_v13  ;;  %v343_v13 = vadd.s32 72, %v1061_v62  ;;  %v342_v14 = vadd.s32 64, %v1061_v62 }
  0xa5   : > { %v247_v12 = vpop.permute.xlu1 %246 }
  0xa6   : > { %v253_v15 = vsel %vm252_vm1, %v247_v12, 0  ;;  %v344_v12 = vadd.s32 80, %v1061_v62 }
  0xad   : > { %v243_v16 = vpop.permute.xlu1 %242 }
  0xae   : > { %v254_v17 = vsel %vm251_vm2, %v243_v16, %v253_v15  ;;  %v341_v15 = vadd.s32 56, %v1061_v62  ;;  %v340_v16 = vadd.s32 48, %v1061_v62 }
  0xaf   : > { %v255_v18 = vadd.s32 %v254_v17, %v1038_v10  ;;  %v339_v17 = vadd.s32 40, %v1061_v62 }
  0xb1   : > { %256 = vrot.lane.b32.xlu1 %v255_v18, %s902_s5  ;;  %260 = vrot.lane.b32.xlu0 %v255_v18, %s900_s21  ;;  %s503_s5 = scalar_lea.sflag [#allocation4], %s1006_s19 }
  0xb9   : > { %272 = vrot.lane.b32.xlu0 %v1024_v1, %s904_s7 }
  0xc1   : > { %290 = vrot.lane.b32.xlu0 %v1024_v1, %s905_s8 }
 0x123   : > { %v257_v22 = vpop.permute.xlu1 %256  ;;  %v261_v23 = vpop.permute.xlu0 %260 }
 0x124   : > { %v267_v24 = vsel %vm266_vm4, %v261_v23, 0 }
 0x125   : > { %v268_v25 = vsel %vm265_vm3, %v257_v22, %v267_v24  ;;  %v225_v22 = vld [vmem:[%s180_s3] sm:$0xff]  ;;  %s660_s3 = sshll.u32 %s888_s12, 3  ;;  %s216_s12 = scalar_lea.vmem [#allocation7], %s1009_s29 }
 0x126   : > { %v269_v26 = vadd.s32 %v268_v25, %v255_v18  ;;  %v338_v18 = vadd.s32 32, %v1061_v62  ;;  %v440_v23 = vand.u32 2147483647, %v225_v22  ;;  %s514_s27 = scalar_lea.hbm %s1160_s2, %s660_s3  ;;  %s516_s4 = sshll.u32 %s216_s12, 4  ;;  %s517_s4 = int_to_ptr.vmem [resolvable:$true] %s516_s4 }
 0x127   : > { %s518_s21 = sshll.u32 %s514_s27, 4  ;;  %s830_s29 = scalar_lea.hbm %s1160_s2, 16  ;;  %s519_s21 = int_to_ptr.hbm [resolvable:$true] %s518_s21 }
 0x128   : > { %270 = vrot.lane.b32.xlu2 %v269_v26, %s904_s7  ;;  %274 = vrot.lane.b32.xlu1 %v269_v26, %s903_s6  ;;  %v441_v24 = vsub.f32 0.0, %v440_v23  ;;  %s824_s6 = sshra.s32 %s519_s21, 4  ;;  %s825_s6 = int_to_ptr.hbm [resolvable:$true] %s824_s6 }
 0x129   : > { %s826_s7 = scalar_lea.hbm %s825_s6, 8  ;;  %p831_p7 = scmp.lt.s32.totalorder %s825_s6, %s1160_s2 }
 0x12a   : > { %v442_v25 = vmul.f32 1.442695, %v441_v24  ;;  %p827_p4 = scmp.ne.s32.totalorder %s825_s6, %s826_s7  ;;  %p832_p8 = scmp.lt.s32.totalorder %s830_s29, %s826_s7 }
 0x12b   : > { %v273_v29 = vpop.permute.xlu0 %272 }
 0x12c   : > { %vm279_vm5 = vcmp.eq.s32.totalorder %v273_v29, %v636_v28  ;;  %746 = vpow2.f32 %v442_v25  ;;  %p828_p5 = pnand %p827_p4, %p980_p9  ;;  %p833_p10 = por %p832_p8, %p831_p7 }
 0x12e   : > { %p829_p6 = pneg %p828_p5 }
 0x130   : > { %286 = vrot.lane.b32.xlu1 %v1024_v1, %s906_s15  ;;  %p834_p13 = pnand %p833_p10, %p829_p6 }
 0x133   : > { %v291_v35 = vpop.permute.xlu0 %290 }
 0x134   : > { %vm294_vm7 = vcmp.eq.s32.totalorder %v291_v35, %v637_v36 }
 0x138   : > { %304 = vrot.lane.b32.xlu1 %v1024_v1, %s907_s16 }
 0x182   : > { %v271_v31 = vpop.permute.xlu2 %270 }
 0x19a   : > { %v275_v30 = vpop.permute.xlu1 %274 }
 0x19b   : > { %v281_v32 = vsel %vm280_vm6, %v275_v30, 0 }
 0x19c   : > { %v282_v33 = vsel %vm279_vm5, %v271_v31, %v281_v32  ;;  %v437_v32 = vmax.f32 %v225_v22, 0.0 }
 0x19d   : > { %v283_v34 = vadd.s32 %v282_v33, %v269_v26  ;;  %v747_v26 = vpop.eup %746 }
 0x19e   : > { %v444_v27 = vadd.f32 1.0, %v747_v26  ;;  %v447_v28 = vmul.f32 -0.5, %v747_v26  ;;  %v450_v31 = vand.u32 2147483647, %v747_v26 }
 0x19f   : > { %284 = vrot.lane.b32.xlu0 %v283_v34, %s906_s15  ;;  %288 = vrot.lane.b32.xlu2 %v283_v34, %s905_s8 }
 0x1a0   : > { %748 = vlog2.f32 %v444_v27  ;;  %v448_v29 = vadd.f32 1.0, %v447_v28 }
 0x1a2   : > { %v287_v37 = vpop.permute.xlu1 %286 }
 0x1a3   : > { %vm293_vm8 = vcmp.eq.s32.totalorder %v287_v37, %v637_v36 }
 0x1a6   : > { %v749_v30 = vpop.eup %748 }
 0x1a7   : > { %300 = vrot.lane.b32.xlu2 %v1024_v1, %s908_s18  ;;  %v446_v8 = vmul.f32 0.6931472, %v749_v30 }
 0x1aa   : > { %v305_v43 = vpop.permute.xlu1 %304 }
 0x1ab   : > { %vm308_vm10 = vcmp.eq.s32.totalorder %v305_v43, %v638_v44 }
 0x1af   : > { %318 = vrot.lane.b32.xlu2 %v1024_v1, %s909_s20 }
 0x1f9   : > { %v289_v38 = vpop.permute.xlu2 %288 }
 0x1fa   : > { %v295_v39 = vsel %vm294_vm7, %v289_v38, 0 }
 0x201   : > { %v301_v45 = vpop.permute.xlu2 %300 }
 0x202   : > { %vm307_vm9 = vcmp.eq.s32.totalorder %v301_v45, %v638_v44 }
 0x209   : > { %v319_v51 = vpop.permute.xlu2 %318 }
 0x20a   : > { %vm322_vm12 = vcmp.eq.s32.totalorder %v319_v51, %v639_v52 }
 0x211   : > { %v285_v40 = vpop.permute.xlu0 %284 }
 0x212   : > { %v296_v41 = vsel %vm293_vm8, %v285_v40, %v295_v39  ;;  %v913_v40 = vmov 0.0  }
 0x213   : > { %v297_v42 = vadd.s32 %v296_v41, %v283_v34 }
 0x215   : > { %298 = vrot.lane.b32.xlu1 %v297_v42, %s908_s18  ;;  %302 = vrot.lane.b32.xlu0 %v297_v42, %s907_s16 }
 0x21d   : > { %314 = vrot.lane.b32.xlu0 %v1024_v1, %s910_s28 }
 0x225   : > { %328 = vrot.lane.b32.xlu0 %v1024_v1, %s911_s30 }
 0x287   : > { %v299_v46 = vpop.permute.xlu1 %298  ;;  %v303_v47 = vpop.permute.xlu0 %302 }
 0x288   : > { %v309_v48 = vsel %vm308_vm10, %v303_v47, 0 }
 0x289   : > { %v310_v49 = vsel %vm307_vm9, %v299_v46, %v309_v48 }
 0x28a   : > { %v311_v50 = vadd.s32 %v310_v49, %v297_v42 }
 0x28c   : > { %312 = vrot.lane.b32.xlu2 %v311_v50, %s910_s28  ;;  %316 = vrot.lane.b32.xlu1 %v311_v50, %s909_s20 }
 0x28f   : > { %v315_v53 = vpop.permute.xlu0 %314 }
 0x290   : > { %vm321_vm11 = vcmp.eq.s32.totalorder %v315_v53, %v639_v52 }
 0x297   : > { %v329_v60 = vpop.permute.xlu0 %328 }
 0x298   : > { %vm331_vm13 = vcmp.eq.s32.totalorder %v329_v60, %v640_v59 }
 0x2e6   : > { %v313_v55 = vpop.permute.xlu2 %312 }
 0x2fe   : > { %v317_v54 = vpop.permute.xlu1 %316 }
 0x2ff   : > { %v323_v56 = vsel %vm322_vm12, %v317_v54, 0 }
 0x300   : > { %v324_v57 = vsel %vm321_vm11, %v313_v55, %v323_v56 }
 0x301   : > { %v325_v58 = vadd.s32 %v324_v57, %v311_v50 }
 0x303   : > { %326 = vrot.lane.b32.xlu1 %v325_v58, %s911_s30 }
 0x375   : > { %v327_v61 = vpop.permute.xlu1 %326 }
 0x376   : > { %v332_v63 = vsel %vm331_vm13, %v327_v61, 0 }
 0x377   : > { %v333_v3 = vadd.s32 %v332_v63, %v325_v58 }
 0x379   : > { %v334_v4 = vsub.s32 %v333_v3, %v1038_v10  ;;  %v345_v10 = vadd.s32 88, %v1061_v62 }
 0x37b   : > { %v367_v6 = vperm.slane %v334_v4, 0 }
 0x37d   : > { %vm383_vm14 = vcmp.eq.s32.totalorder %v367_v6, %v349_v5  ;;  %vm382_vm1 = vcmp.eq.s32.totalorder %v367_v6, %v348_v7  ;;  %vm381_vm3 = vcmp.eq.s32.totalorder %v367_v6, %v347_v11  ;;  %vm380_vm5 = vcmp.eq.s32.totalorder %v367_v6, %v346_v0 }
 0x37e   : > { %vm400_vm15 = vmand %vm383_vm14, %vm238_vm0  ;;  %vm379_vm7 = vcmp.eq.s32.totalorder %v367_v6, %v345_v10  ;;  %vm378_vm9 = vcmp.eq.s32.totalorder %v367_v6, %v344_v12  ;;  %vm377_vm11 = vcmp.eq.s32.totalorder %v367_v6, %v343_v13  ;;  %vm376_vm13 = vcmp.eq.s32.totalorder %v367_v6, %v342_v14 }
 0x37f   : > { %641 = vmatpush.xpose.msk.msra.mxu0 %vm400_vm15, %v912_v9  ;;  %vm399_vm2 = vmand %vm382_vm1, %vm238_vm0  ;;  %vm375_vm15 = vcmp.eq.s32.totalorder %v367_v6, %v341_v15 }
 0x380   : > { %vm398_vm4 = vmand %vm381_vm3, %vm238_vm0 }
 0x381   : > { %vm397_vm6 = vmand %vm380_vm5, %vm238_vm0 }
 0x382   : > { %vm396_vm8 = vmand %vm379_vm7, %vm238_vm0 }
 0x383   : > { %642 = vmatpush.xpose.msk.msra.mxu0 %vm399_vm2, %v912_v9  ;;  %vm395_vm10 = vmand %vm378_vm9, %vm238_vm0  ;;  %vm374_vm2 = vcmp.eq.s32.totalorder %v367_v6, %v340_v16 }
 0x384   : > { %vm394_vm12 = vmand %vm377_vm11, %vm238_vm0 }
 0x385   : > { %vm393_vm14 = vmand %vm376_vm13, %vm238_vm0 }
 0x386   : > { %vm392_vm1 = vmand %vm375_vm15, %vm238_vm0 }
 0x387   : > { %643 = vmatpush.xpose.msk.msra.mxu0 %vm398_vm4, %v912_v9  ;;  %vm391_vm3 = vmand %vm374_vm2, %vm238_vm0  ;;  %vm373_vm4 = vcmp.eq.s32.totalorder %v367_v6, %v339_v17  ;;  %vm451_vm2 = vcmp.lt.f32.partialorder %v450_v31, 0.0004427343 }
 0x388   : > { %vm390_vm5 = vmand %vm373_vm4, %vm238_vm0 }
 0x38b   : > { %644 = vmatpush.xpose.msk.msra.mxu0 %vm397_vm6, %v912_v9  ;;  %vm372_vm6 = vcmp.eq.s32.totalorder %v367_v6, %v338_v18 }
 0x38c   : > { %vm389_vm7 = vmand %vm372_vm6, %vm238_vm0  ;;  %vm465_vm6 = vcmp.lt.s32.totalorder %v1024_v1, 16 }
 0x38f   : > { %645 = vmatpush.xpose.msk.msra.mxu0 %vm396_vm8, %v912_v9  ;;  %vm371_vm8 = vcmp.eq.s32.totalorder %v367_v6, %v337_v19 }
 0x390   : > { %vm388_vm9 = vmand %vm371_vm8, %vm238_vm0 }
 0x393   : > { %646 = vmatpush.xpose.msk.msra.mxu0 %vm395_vm10, %v912_v9  ;;  %vm370_vm10 = vcmp.eq.s32.totalorder %v367_v6, %v336_v20 }
 0x394   : > { %vm387_vm11 = vmand %vm370_vm10, %vm238_vm0 }
 0x397   : > { %647 = vmatpush.xpose.msk.msra.mxu0 %vm394_vm12, %v912_v9  ;;  %vm369_vm12 = vcmp.eq.s32.totalorder %v367_v6, %v335_v21 }
 0x398   : > { %vm386_vm13 = vmand %vm369_vm12, %vm238_vm0 }
 0x39b   : > { %648 = vmatpush.xpose.msk.msra.mxu0 %vm393_vm14, %v912_v9  ;;  %vm368_vm14 = vcmp.eq.s32.totalorder %v367_v6, %v1061_v62 }
 0x39c   : > { %vm385_vm15 = vmand %vm368_vm14, %vm238_vm0  ;;  %vm222_vm0 = vcmp.lt.s32.totalorder %v1061_v62, 5 }
 0x39f   : > { %649 = vmatpush.xpose.msk.msra.mxu0 %vm392_vm1, %v912_v9  ;;  %vm221_vm1 = vcmp.ge.s32.totalorder %v1061_v62, 1 }
 0x3a0   : > { %vm223_vm4 = vmand %vm221_vm1, %vm222_vm0 }
 0x3a1   : > { %v224_v42 = vsel %vm223_vm4, 0.0078125, %v913_v40 }
 0x3a3   : > { %650 = vmatpush.xpose.msk.msra.mxu0 %vm391_vm3, %v912_v9  ;;  %vm219_vm3 = vcmp.eq.s32.totalorder %v1061_v62, 0 }
 0x3a4   : > { %v220_v41 = vsel %vm219_vm3, 0.03125, %v913_v40 }
 0x3a7   : > { %651 = vmatpush.xpose.msk.msra.mxu0 %vm390_vm5, %v912_v9 }
 0x3ab   : > { %652 = vmatpush.xpose.msk.msra.mxu0 %vm389_vm7, %v912_v9 }
 0x3af   : > { %653 = vmatpush.xpose.msk.msra.mxu0 %vm388_vm9, %v912_v9 }
 0x3b3   : > { %654 = vmatpush.xpose.msk.msra.mxu0 %vm387_vm11, %v912_v9 }
 0x3b7   : > { %655 = vmatpush.xpose.msk.msra.mxu0 %vm386_vm13, %v912_v9 }
 0x3bb   : > { %656 = vmatpush.xpose.msk.msra.mxu0 %vm385_vm15, %v912_v9 }
 0x3be   : > { %433 = vmatmul.f32.vlgmr.msra.gmra.mxu0 %v1027_v2  ;;  %v449_v2 = vmul.f32 %v747_v26, %v448_v29 }
 0x3c0   : > { %v452_v36 = vsel %vm451_vm2, %v449_v2, %v446_v8 }
 0x43b   : > { %v434_v33 = vpop.f32.mrf.mxu0 }
 0x43c   : > { %v438_v34 = vmul.f32 %v434_v33, %v225_v22  ;;  %v454_v35 = vsub.f32 %v225_v22, %v434_v33 }
 0x43e   : > { %v439_v37 = vsub.f32 %v437_v32, %v438_v34  ;;  %v455_v38 = vand.u32 2147483647, %v454_v35  ;;  %v457_v39 = vmul.f32 0.5, %v454_v35 }
 0x440   : > { %v453_v43 = vadd.f32 %v452_v36, %v439_v37  ;;  %vm456_vm5 = vcmp.lt.f32.partialorder %v455_v38, 1.0  ;;  %v458_v44 = vmul.f32 %v457_v39, %v454_v35  ;;  %v657_v45 = vadd.f32 -0.5, %v455_v38 }
 0x442   : > { %v460_v46 = vsel %vm456_vm5, %v458_v44, %v657_v45  ;;  %v461_v47 = vmul.f32 %v453_v43, %v220_v41 }
 0x443   : > { %v462_v48 = vmul.f32 %v460_v46, %v224_v42 }
 0x445   : > { %v463_v49 = vadd.f32 %v462_v48, %v461_v47 }
 0x447   : > { %v466_v50 = vsel %vm465_vm6, %v463_v49, 0.0 }
 0x448   : > { %467 = vst [vmem:[%s216_s12] sm:$0xff] %v466_v50 }
 0x449   : > { %837 = shalt.err (!%p834_p13)
}
 0x44a   : > { %667 = dma.vmem_to_hbm [thread:$0]  (%p980_p9), %s517_s4, 128, %s519_s21, %s503_s5  }
 0x44b PF: > { %s530_s19 = sand.u32 1, %s876_s9   ;;  %p677_p0 = pnand %p625_p12, %p987_p11 }
 0x44c   : > { %s531_s20 = scalar_lea.sflag [#allocation4], %s530_s19 }
 0x44d   : > { %p678_p1 = pneg %p677_p0 }
 0x44f   : > { %871 = dma.done.wait (%p678_p1), %s531_s20, 128  }
 0x450   : > { %873 = vsyncadd (%p678_p1), %s531_s20, 4294967168  ;;  %s21_s14 = sadd.s32 1, %s896_s14   ;;  %s1165_s9 = smov %s880_s10 }
 0x451   : > { %p18_p2 = scmp.ge.s32.totalorder %s21_s14, 4   ;;  %s1166_s10 = smov %s884_s11 }
 0x452   : > { %s1167_s11 = smov %s985_s23  ;;  %s1168_s12 = smov %s892_s13 }
 0x453   : > { %s1169_s13 = smov %s1171_s17  ;;  %20 = sbr.rel (!%p18_p2) target bundleno = 8 (0x8), region = 94 }
 0x458   :  { %537 = vsyncpa [#allocation3], 1 }
 0x459   :  { %539 = vsyncpa [#allocation3 + $0x1], 1 }
 0x45a   :  { %540 = vsyncpa [#allocation6], 1 }
 0x45b   :  { %542 = vsyncpa [#allocation6 + $0x1], 1 }
 0x45c   :  { %543 = vsyncpa [#allocation4], 1 }
 0x45d   :  { %545 = vsyncpa [#allocation4 + $0x1], 1 }

</bundles_post_ra>
